<compile_context>
chip_gen: v6e
topology: v6e:2x2x1
jax: 0.10.0
libtpu: 0.0.40
codegen_flags: <defaults>
</compile_context>

<pallas_src>
import math
import jax
import jax.numpy as jnp
from jax.experimental import pallas as pl
from jax.experimental.pallas import tpu as pltpu


def _round_up(v, m):
    return (v + m - 1) // m * m


def _gelu_exact(x):
    # torch.nn.GELU() default = exact erf-based GELU (computed in f32).
    return 0.5 * x * (1.0 + jax.lax.erf(x * (1.0 / math.sqrt(2.0))))


def ffn_kernel(x_ref, w1_ref, b1_ref, w2_ref, b2_ref, o_ref, acc_ref):
    # x_ref:  (TM, C)  f32/bf16     w1_ref: (C, TK) bf16   b1_ref: (1, TK) f32
    # w2_ref: (TK, C)  bf16         b2_ref: (1, C)  f32
    # o_ref:  (TM, C)  out dtype    acc_ref:(TM, C) f32 scratch
    k = pl.program_id(1)

    @pl.when(k == 0)
    def _init():
        acc_ref[...] = jnp.zeros_like(acc_ref)

    x = x_ref[...].astype(w1_ref.dtype)                       # in-kernel bf16 cast
    h = jnp.dot(x, w1_ref[...], preferred_element_type=jnp.float32) + b1_ref[...]
    h = _gelu_exact(h)                                        # exact erf GELU, f32
    acc_ref[...] += jnp.dot(h.astype(w2_ref.dtype), w2_ref[...],
                            preferred_element_type=jnp.float32)

    @pl.when(k == pl.num_programs(1) - 1)
    def _finalize():
        o_ref[...] = (acc_ref[...] + b2_ref[...]).astype(o_ref.dtype)


def feedforward_pallas(x, w1, b1, w2, b2, *, tm=512, inner_chunk=2048,
                       compute_dtype=jnp.bfloat16, out_dtype=None,
                       vmem_limit_bytes=None):
    """x: (B, N, C) channels-last; w1: (C, I), b1: (I,), w2: (I, C), b2: (C,)."""
    B, N, C = x.shape
    I = w1.shape[1]
    M = B * N
    out_dtype = x.dtype if out_dtype is None else out_dtype

    cdt_size = jnp.dtype(compute_dtype).itemsize
    x_size = jnp.dtype(x.dtype).itemsize
    o_size = jnp.dtype(out_dtype).itemsize

    # ---- Inner (I) split: pad I (weights only) to a multiple of the chunk. ----
    lane = 128
    I_lane = _round_up(I, lane)
    nk = max(1, pl.cdiv(I_lane, max(inner_chunk, lane)))
    tk = _round_up(pl.cdiv(I_lane, nk), lane)
    I_pad = tk * nk

    # ---- Token tile sizing from the real VMEM budget. ----
    granule = 16                                     # bf16 (16,128) sublane packing
    tm_eff = max(granule, min(_round_up(tm, granule), _round_up(M, granule)))

    def footprint(t):
        return (2 * t * C * x_size                   # x double-buffered
                + 2 * t * C * o_size                 # out double-buffered
                + 2 * C * tk * cdt_size              # W1 chunk double-buffered
                + 2 * tk * C * cdt_size              # W2 chunk double-buffered
                + 2 * tk * 4 + 2 * C * 4             # biases
                + t * C * 4                          # f32 accumulator scratch
                + t * tk * (4 + cdt_size))           # f32 hidden + bf16 copy

    try:
        phys_vmem = int(pltpu.get_tpu_info().vmem_capacity_bytes)
    except Exception:
        phys_vmem = 64 << 20                         # conservative (v7x per-TC)

    budget = int(phys_vmem * 0.8) if vmem_limit_bytes is None else vmem_limit_bytes
    while footprint(tm_eff) > budget and tm_eff > 4 * granule:
        tm_eff = max(granule, _round_up(tm_eff // 2, granule))

    # Ensure >= 2 grid steps along M so both v7x TensorCores get work.
    if pl.cdiv(M, tm_eff) < 2 and M > granule:
        tm_eff = _round_up(pl.cdiv(M, 2), granule)

    if vmem_limit_bytes is None:
        vmem_limit_bytes = max(32 << 20,
                               min(int(footprint(tm_eff) * 1.7) + (4 << 20),
                                   int(phys_vmem * 0.85)))

    grid = (pl.cdiv(M, tm_eff), nk)

    # ---- Pad / cast weights only (zero padding is exact: GELU(0)=0, W2 pad rows=0). ----
    w1p = jnp.pad(w1.astype(compute_dtype), ((0, 0), (0, I_pad - I)))
    w2p = jnp.pad(w2.astype(compute_dtype), ((0, I_pad - I), (0, 0)))
    b1p = jnp.pad(b1.astype(jnp.float32).reshape(1, I), ((0, 0), (0, I_pad - I)))
    b2p = b2.astype(jnp.float32).reshape(1, C)

    x2 = x.reshape(M, C)                             # contiguous reshape, no copy

    cost = pl.CostEstimate(
        flops=4 * M * C * I,                         # two matmuls
        transcendentals=M * I,                       # erf per hidden element
        bytes_accessed=(M * C * x_size + M * C * o_size
                        + 2 * C * I * cdt_size + 4 * (I + C)),
    )

    out = pl.pallas_call(
        ffn_kernel,
        out_shape=jax.ShapeDtypeStruct((M, C), out_dtype),
        grid_spec=pltpu.PrefetchScalarGridSpec(
            num_scalar_prefetch=0,
            grid=grid,
            in_specs=[
                pl.BlockSpec((tm_eff, C), lambda i, k: (i, 0)),   # x tile
                pl.BlockSpec((C, tk), lambda i, k: (0, k)),       # W1 chunk
                pl.BlockSpec((1, tk), lambda i, k: (0, k)),       # b1 chunk
                pl.BlockSpec((tk, C), lambda i, k: (k, 0)),       # W2 chunk
                pl.BlockSpec((1, C), lambda i, k: (0, 0)),        # b2
            ],
            out_specs=pl.BlockSpec((tm_eff, C), lambda i, k: (i, 0)),
            scratch_shapes=[pltpu.VMEM((tm_eff, C), jnp.float32)],
        ),
        compiler_params=pltpu.CompilerParams(
            dimension_semantics=("parallel", "arbitrary"),
            vmem_limit_bytes=vmem_limit_bytes,
        ),
        cost_estimate=cost,
    )(x2, w1p, b1p, w2p, b2p)

    return out.reshape(B, N, C).astype(out_dtype)


def feedforward_ref(x, w1, b1, w2, b2):
    h = jnp.einsum("bnc,ci->bni", x, w1) + b1
    h = _gelu_exact(h)
    return jnp.einsum("bni,ic->bnc", h, w2) + b2


# TODO(synk): only act='default' (Linear+GELU) is implemented; the 'swiglu'/'geglu'
# branches and dropout with p > 0 (RNG masking) are not translated.

if __name__ == "__main__":
    # ---- Test 1: module-consistent small shapes (channels=32, expand=4 -> inner=128).
    B, N, C = 2, 256, 32
    expand = 4
    I = C * expand

    key = jax.random.PRNGKey(0)
    k_x, k_w1, k_b1, k_w2, k_b2 = jax.random.split(key, 5)

    x = jax.random.normal(k_x, (B, N, C), dtype=jnp.float32)
    w1 = jax.random.normal(k_w1, (C, I), dtype=jnp.float32) * 0.05
    b1 = jax.random.normal(k_b1, (I,), dtype=jnp.float32) * 0.05
    w2 = jax.random.normal(k_w2, (I, C), dtype=jnp.float32) * 0.05
    b2 = jax.random.normal(k_b2, (C,), dtype=jnp.float32) * 0.05

    y = feedforward_pallas(x, w1, b1, w2, b2)        # auto: tm=256 (2 M-steps), 1 I-chunk
    y = jax.block_until_ready(y)
    y_ref = feedforward_ref(x, w1, b1, w2, b2)
    assert y.shape == y_ref.shape
    # bf16 MXU operands vs f32 reference -> loosened tolerance.
    assert jnp.allclose(y, y_ref, atol=2e-2, rtol=2e-2), "mismatch vs reference (test 1)"

    # ---- Test 2: exercises partial M tile, non-128 C, and the multi-chunk I reduction.
    B2, N2, C2 = 1, 200, 48
    I2 = C2 * 4                                      # 192 -> padded to 256, 2 chunks of 128
    k_x, k_w1, k_b1, k_w2, k_b2 = jax.random.split(jax.random.PRNGKey(1), 5)
    x_b = jax.random.normal(k_x, (B2, N2, C2), dtype=jnp.float32)
    w1_b = jax.random.normal(k_w1, (C2, I2), dtype=jnp.float32) * 0.05
    b1_b = jax.random.normal(k_b1, (I2,), dtype=jnp.float32) * 0.05
    w2_b = jax.random.normal(k_w2, (I2, C2), dtype=jnp.float32) * 0.05
    b2_b = jax.random.normal(k_b2, (C2,), dtype=jnp.float32) * 0.05

    y_b = feedforward_pallas(x_b, w1_b, b1_b, w2_b, b2_b, inner_chunk=128)
    y_b = jax.block_until_ready(y_b)
    y_b_ref = feedforward_ref(x_b, w1_b, b1_b, w2_b, b2_b)
    assert jnp.allclose(y_b, y_b_ref, atol=2e-2, rtol=2e-2), "mismatch vs reference (test 2)"

    print("KERNEL_OK")
</pallas_src>

<mosaic_0001>
module attributes {stable_mosaic.version = 11 : i64} {
  func.func @ffn_kernel(%arg0: i32, %arg1: i32, %arg2: memref<256x32xf32, #tpu.memory_space<vmem>>, %arg3: memref<32x128xbf16, #tpu.memory_space<vmem>>, %arg4: memref<1x128xf32, #tpu.memory_space<vmem>>, %arg5: memref<128x32xbf16, #tpu.memory_space<vmem>>, %arg6: memref<1x32xf32, #tpu.memory_space<vmem>>, %arg7: memref<256x32xf32, #tpu.memory_space<vmem>>, %arg8: memref<256x32xf32, #tpu.memory_space<vmem>>) attributes {dimension_semantics = [#tpu.dimension_semantics<parallel>, #tpu.dimension_semantics<arbitrary>], iteration_bounds = array<i64: 2, 1>, scalar_prefetch = 0 : i64, scratch_operands = 1 : i64, tpu.core_type = #tpu.core_type<tc>, window_params = [{transform_indices = @transform_0, window_bounds = array<i64: 256, 32>}, {transform_indices = @transform_1, window_bounds = array<i64: 32, 128>}, {transform_indices = @transform_2, window_bounds = array<i64: 1, 128>}, {transform_indices = @transform_3, window_bounds = array<i64: 128, 32>}, {pipeline_mode = #tpu.pipeline_mode<synchronous>, transform_indices = @transform_4, window_bounds = array<i64: 1, 32>}, {transform_indices = @transform_5, window_bounds = array<i64: 256, 32>}]} {
    %c0_i32 = arith.constant 0 : i32
    %0 = arith.cmpi eq, %arg1, %c0_i32 : i32
    %1 = arith.extui %0 : i1 to i32
    %c0_i32_0 = arith.constant 0 : i32
    %2 = arith.cmpi ne, %1, %c0_i32_0 : i32
    scf.if %2 {
      %cst_18 = arith.constant 0.000000e+00 : f32
      %27 = vector.broadcast %cst_18 : f32 to vector<256x32xf32>
      %c0_19 = arith.constant 0 : index
      %c0_20 = arith.constant 0 : index
      %28 = vector.load %arg8[%c0_19, %c0_20] : memref<256x32xf32, #tpu.memory_space<vmem>>, vector<256x32xf32>
      tpu.vector_store %arg8[%c0_19, %c0_20], %27 {strides = array<i32>} : memref<256x32xf32, #tpu.memory_space<vmem>>, vector<256x32xf32>,
    } else {
    }
    %c0 = arith.constant 0 : index
    %c0_1 = arith.constant 0 : index
    %3 = vector.load %arg2[%c0, %c0_1] : memref<256x32xf32, #tpu.memory_space<vmem>>, vector<256x32xf32>
    %4 = arith.truncf %3 : vector<256x32xf32> to vector<256x32xbf16>
    %c0_2 = arith.constant 0 : index
    %c0_3 = arith.constant 0 : index
    %5 = vector.load %arg3[%c0_2, %c0_3] : memref<32x128xbf16, #tpu.memory_space<vmem>>, vector<32x128xbf16>
    %cst = arith.constant dense<0.000000e+00> : vector<256x128xf32>
    %6 = tpu.matmul %4, %5, %cst {dimension_numbers = #tpu.dot_dimension_numbers<[1], [0], [0], [1], [0, 0, 1, 1], [], []>} : vector<256x32xbf16>, vector<32x128xbf16>, vector<256x128xf32> -> vector<256x128xf32>
    %c0_4 = arith.constant 0 : index
    %c0_5 = arith.constant 0 : index
    %7 = vector.load %arg4[%c0_4, %c0_5] : memref<1x128xf32, #tpu.memory_space<vmem>>, vector<1x128xf32>
    %8 = vector.broadcast %7 : vector<1x128xf32> to vector<256x128xf32>
    %9 = arith.addf %6, %8 : vector<256x128xf32>
    %cst_6 = arith.constant 5.000000e-01 : f32
    %10 = vector.broadcast %cst_6 : f32 to vector<256x128xf32>
    %11 = arith.mulf %10, %9 : vector<256x128xf32>
    %cst_7 = arith.constant 0.707106769 : f32
    %12 = vector.broadcast %cst_7 : f32 to vector<256x128xf32>
    %13 = arith.mulf %9, %12 : vector<256x128xf32>
    %14 = math.erf %13 : vector<256x128xf32>
    %cst_8 = arith.constant 1.000000e+00 : f32
    %15 = vector.broadcast %cst_8 : f32 to vector<256x128xf32>
    %16 = arith.addf %15, %14 : vector<256x128xf32>
    %17 = arith.mulf %11, %16 : vector<256x128xf32>
    %c0_9 = arith.constant 0 : index
    %c0_10 = arith.constant 0 : index
    %18 = vector.load %arg8[%c0_9, %c0_10] : memref<256x32xf32, #tpu.memory_space<vmem>>, vector<256x32xf32>
    %19 = arith.truncf %17 : vector<256x128xf32> to vector<256x128xbf16>
    %c0_11 = arith.constant 0 : index
    %c0_12 = arith.constant 0 : index
    %20 = vector.load %arg5[%c0_11, %c0_12] : memref<128x32xbf16, #tpu.memory_space<vmem>>, vector<128x32xbf16>
    %cst_13 = arith.constant dense<0.000000e+00> : vector<256x32xf32>
    %21 = tpu.matmul %19, %20, %cst_13 {dimension_numbers = #tpu.dot_dimension_numbers<[1], [0], [0], [1], [0, 0, 1, 1], [], []>} : vector<256x128xbf16>, vector<128x32xbf16>, vector<256x32xf32> -> vector<256x32xf32>
    %22 = arith.addf %18, %21 : vector<256x32xf32>
    %c0_14 = arith.constant 0 : index
    %c0_15 = arith.constant 0 : index
    %23 = vector.load %arg8[%c0_14, %c0_15] : memref<256x32xf32, #tpu.memory_space<vmem>>, vector<256x32xf32>
    tpu.vector_store %arg8[%c0_14, %c0_15], %22 {strides = array<i32>} : memref<256x32xf32, #tpu.memory_space<vmem>>, vector<256x32xf32>,
    %c0_i32_16 = arith.constant 0 : i32
    %24 = arith.cmpi eq, %arg1, %c0_i32_16 : i32
    %25 = arith.extui %24 : i1 to i32
    %c0_i32_17 = arith.constant 0 : i32
    %26 = arith.cmpi ne, %25, %c0_i32_17 : i32
    scf.if %26 {
      %c0_18 = arith.constant 0 : index
      %c0_19 = arith.constant 0 : index
      %27 = vector.load %arg8[%c0_18, %c0_19] : memref<256x32xf32, #tpu.memory_space<vmem>>, vector<256x32xf32>
      %c0_20 = arith.constant 0 : index
      %c0_21 = arith.constant 0 : index
      %28 = vector.load %arg6[%c0_20, %c0_21] : memref<1x32xf32, #tpu.memory_space<vmem>>, vector<1x32xf32>
      %29 = vector.broadcast %28 : vector<1x32xf32> to vector<256x32xf32>
      %30 = arith.addf %27, %29 : vector<256x32xf32>
      %c0_22 = arith.constant 0 : index
      %c0_23 = arith.constant 0 : index
      %31 = vector.load %arg7[%c0_22, %c0_23] : memref<256x32xf32, #tpu.memory_space<vmem>>, vector<256x32xf32>
      tpu.vector_store %arg7[%c0_22, %c0_23], %30 {strides = array<i32>} : memref<256x32xf32, #tpu.memory_space<vmem>>, vector<256x32xf32>,
    } else {
    }
    return
  }
  func.func @transform_0(%arg0: i32, %arg1: i32) -> (i32, i32) {
    %c0_i32 = arith.constant 0 : i32
    %c0_i32_0 = arith.constant 0 : i32
    return %arg0, %c0_i32 : i32, i32
  }
  func.func @transform_1(%arg0: i32, %arg1: i32) -> (i32, i32) {
    %c0_i32 = arith.constant 0 : i32
    %c0_i32_0 = arith.constant 0 : i32
    return %c0_i32, %arg1 : i32, i32
  }
  func.func @transform_2(%arg0: i32, %arg1: i32) -> (i32, i32) {
    %c0_i32 = arith.constant 0 : i32
    %c0_i32_0 = arith.constant 0 : i32
    return %c0_i32, %arg1 : i32, i32
  }
  func.func @transform_3(%arg0: i32, %arg1: i32) -> (i32, i32) {
    %c0_i32 = arith.constant 0 : i32
    %c0_i32_0 = arith.constant 0 : i32
    return %arg1, %c0_i32 : i32, i32
  }
  func.func @transform_4(%arg0: i32, %arg1: i32) -> (i32, i32) {
    %c0_i32 = arith.constant 0 : i32
    %c0_i32_0 = arith.constant 0 : i32
    %c0_i32_1 = arith.constant 0 : i32
    return %c0_i32, %c0_i32_0 : i32, i32
  }
  func.func @transform_5(%arg0: i32, %arg1: i32) -> (i32, i32) {
    %c0_i32 = arith.constant 0 : i32
    %c0_i32_0 = arith.constant 0 : i32
    return %arg0, %c0_i32 : i32, i32
  }
}

</mosaic_0001>

<bundles_post_ra>
// kernel: tpu_custom_call.1
= control target key start
LH: loop header
LB: loop body
LE: loop exit
PB: predicated region body
PF: predicated region fallthrough
CT: control target
= control target key end

     0   :  { %s1660_s18 = smov 0   ;;  %s1662_s19 = smov 0   ;;  %s2088_s0 = inlined_call_operand.vmem [shape: f32[512,32], index: 0, kind: input, shape index: {}]   ;;  %s2089_s1 = inlined_call_operand.vmem [shape: bf16[32,128], index: 1, kind: input, shape index: {}]   ;;  %s2090_s2 = inlined_call_operand.vmem [shape: f32[1,128], index: 2, kind: input, shape index: {}]   ;;  %s2091_s3 = inlined_call_operand.vmem [shape: bf16[128,32], index: 3, kind: input, shape index: {}]   ;;  %s2092_s4 = inlined_call_operand.vmem [shape: f32[1,32], index: 4, kind: input, shape index: {}]   ;;  %s2093_s5 = inlined_call_operand.vmem [shape: f32[512,32], index: 5, kind: output, shape index: {}]  }
   0x1   :  { %s1664_s20 = smov 0  }
   0x2 LB: > { %s27_s21 = sadd.s32 1, %s1623_s19  ;;  %p1329_p0 = scmp.ge.s32.totalorder %s1627_s20, 1  ;;  %s1627_s20 = sphi %s1664_s20, %s15_s20   ;;  %s1623_s19 = sphi %s1662_s19, %s2095_s19   ;;  %s1619_s18 = sphi %s1660_s18, %s2094_s18  }
   0x3   : > { %p29_p1 = scmp.ge.s32.totalorder %s27_s21, 2  ;;  %p228_p2 = scmp.lt.s32.totalorder %s1627_s20, 3 }
   0x5   : > { %s2097_s21 = smov (%p29_p1, %s27_s21), 0  ;;  %p229_p3 = pnand %p1329_p0, %p228_p2 }
   0x6   : > { %s1330_s24 = sshll.u32 (!%p229_p3), %s1619_s18, 5 }
   0x7   : > { %232 = sbr.rel (%p229_p3) target bundleno = 514 (0x202), region = 40  ;;  %p269_p4 = scmp.lt.s32.totalorder (!%p229_p3), %s1330_s24, 63 }
   0xc   : > { %v1531_v0 = vld [vmem:[%s2089_s1 + $0x8] sm:$0xff]   ;;  %v1532_v1 = vld [vmem:[%s2089_s1] sm:$0xff]   ;;  %s2099_s24 = smov (!%p269_p4, %s1330_s24), 63  ;;  %vm298_vm0 = vcmask 261120   ;;  %v1533_v50 = vld [vmem:[%s2091_s3 + $0x38] sm:$0xff]   ;;  %v1629_v58 = vmov 0.0  }
   0xd   : > { %1406 = vmatprep.subr.bf16.mxu0 %v1531_v0  ;;  %s1331_s27 = sshll.u32 %s2099_s24, 3  ;;  %1490 = vmatprep.subr.bf16.mxu1 %v1533_v50  ;;  %v1534_v51 = vld [vmem:[%s2091_s3 + $0x30] sm:$0xff]   ;;  %v1535_v52 = vld [vmem:[%s2091_s3 + $0x28] sm:$0xff]   ;;  %v1536_v53 = vld [vmem:[%s2091_s3 + $0x20] sm:$0xff]   ;;  %301 = vst.msk [vmem:[#allocation2 + $0x10] sm:$0xff] %vm298_vm0, %v1629_v58 }
   0xe   : > { %1407 = vmatpush3.bf16.msra.mxu0 %v1531_v0  ;;  %s1692_s30 = scalar_lea.vmem %s2088_s0, %s1331_s27  ;;  %1498 = vmatpush3.bf16.msra.mxu1 %v1533_v50  ;;  %v1537_v54 = vld [vmem:[%s2091_s3 + $0x18] sm:$0xff]   ;;  %v1538_v55 = vld [vmem:[%s2091_s3 + $0x10] sm:$0xff]   ;;  %v1539_v56 = vld [vmem:[%s2091_s3 + $0x8] sm:$0xff]   ;;  %299 = vst.msk [vmem:[#allocation2] sm:$0xff] %vm298_vm0, %v1629_v58  ;;  %s1953_s8 = scalar_lea.vmem %s2093_s5, %s1331_s27 }
   0xf   : > { %1408 = vmatprep.subr.bf16.mxu0 %v1532_v1  ;;  %v331_v2 = vld [vmem:[%s1692_s30] sm:$0xff]  ;;  %v332_v3 = vld [vmem:[%s1692_s30 + $0x8] sm:$0xff]  ;;  %v333_v4 = vld [vmem:[%s1692_s30 + $0x10] sm:$0xff]  ;;  %1491 = vmatprep.subr.bf16.mxu1 %v1534_v51  ;;  %300 = vst.msk [vmem:[#allocation2 + $0x8] sm:$0xff] %vm298_vm0, %v1629_v58 }
  0x10   : > { %v363_v5 = vpack.c.bf16 %v332_v3, %v331_v2  ;;  %v334_v6 = vld [vmem:[%s1692_s30 + $0x18] sm:$0xff]  ;;  %v335_v7 = vld [vmem:[%s1692_s30 + $0x20] sm:$0xff]  ;;  %v336_v8 = vld [vmem:[%s1692_s30 + $0x28] sm:$0xff]  ;;  %302 = vst.msk [vmem:[#allocation2 + $0x18] sm:$0xff] %vm298_vm0, %v1629_v58 }
  0x11   : > { %v364_v9 = vpack.c.bf16 %v334_v6, %v333_v4  ;;  %v365_v10 = vpack.c.bf16 %v336_v8, %v335_v7  ;;  %v337_v11 = vld [vmem:[%s1692_s30 + $0x30] sm:$0xff]  ;;  %v338_v12 = vld [vmem:[%s1692_s30 + $0x38] sm:$0xff]  ;;  %v339_v13 = vld [vmem:[%s1692_s30 + $0x40] sm:$0xff]  ;;  %303 = vst.msk [vmem:[#allocation2 + $0x20] sm:$0xff] %vm298_vm0, %v1629_v58 }
  0x12   : > { %1409 = vmatpush3.bf16.msra.mxu0 %v1532_v1  ;;  %1410 = vmatprep.mubr.msk.bf16.mxu0 %vm298_vm0, %v363_v5  ;;  %v340_v14 = vld [vmem:[%s1692_s30 + $0x48] sm:$0xff]  ;;  %v366_v15 = vpack.c.bf16 %v338_v12, %v337_v11  ;;  %v341_v17 = vld [vmem:[%s1692_s30 + $0x50] sm:$0xff]  ;;  %v342_v18 = vld [vmem:[%s1692_s30 + $0x58] sm:$0xff]  ;;  %304 = vst.msk [vmem:[#allocation2 + $0x28] sm:$0xff] %vm298_vm0, %v1629_v58 }
  0x13   : > { %v367_v16 = vpack.c.bf16 %v340_v14, %v339_v13  ;;  %v343_v19 = vld [vmem:[%s1692_s30 + $0x60] sm:$0xff]  ;;  %v344_v20 = vld [vmem:[%s1692_s30 + $0x68] sm:$0xff]  ;;  %v368_v21 = vpack.c.bf16 %v342_v18, %v341_v17  ;;  %v345_v23 = vld [vmem:[%s1692_s30 + $0x70] sm:$0xff]  ;;  %1442 = vmatprep.subr.bf16.mxu0 %v1533_v50  ;;  %1499 = vmatpush3.bf16.msra.mxu1 %v1534_v51  ;;  %305 = vst.msk [vmem:[#allocation2 + $0x30] sm:$0xff] %vm298_vm0, %v1629_v58 }
  0x14   : > { %v369_v22 = vpack.c.bf16 %v344_v20, %v343_v19  ;;  %v346_v24 = vld [vmem:[%s1692_s30 + $0x78] sm:$0xff]  ;;  %v347_v25 = vld [vmem:[%s1692_s30 + $0x80] sm:$0xff]  ;;  %v348_v26 = vld [vmem:[%s1692_s30 + $0x88] sm:$0xff]  ;;  %1492 = vmatprep.subr.bf16.mxu1 %v1535_v52  ;;  %306 = vst.msk [vmem:[#allocation2 + $0x38] sm:$0xff] %vm298_vm0, %v1629_v58 }
  0x15   : > { %1411 = vmatmul.mubr.msk.bf16.vlgmr.msra.gmra.mxu0 %vm298_vm0, %v364_v9  ;;  %v370_v27 = vpack.c.bf16 %v346_v24, %v345_v23  ;;  %v371_v28 = vpack.c.bf16 %v348_v26, %v347_v25  ;;  %v349_v29 = vld [vmem:[%s1692_s30 + $0x90] sm:$0xff]  ;;  %v350_v30 = vld [vmem:[%s1692_s30 + $0x98] sm:$0xff]  ;;  %v351_v31 = vld [vmem:[%s1692_s30 + $0xa0] sm:$0xff]  ;;  %307 = vst.msk [vmem:[#allocation2 + $0x40] sm:$0xff] %vm298_vm0, %v1629_v58 }
  0x16   : > { %1414 = vmatprep.mubr.msk.bf16.mxu0 %vm298_vm0, %v365_v10  ;;  %v352_v32 = vld [vmem:[%s1692_s30 + $0xa8] sm:$0xff]  ;;  %v372_v33 = vpack.c.bf16 %v350_v30, %v349_v29  ;;  %v353_v35 = vld [vmem:[%s1692_s30 + $0xb0] sm:$0xff]  ;;  %v354_v36 = vld [vmem:[%s1692_s30 + $0xb8] sm:$0xff]  ;;  %1443 = vmatpush3.bf16.msra.mxu0 %v1533_v50  ;;  %308 = vst.msk [vmem:[#allocation2 + $0x48] sm:$0xff] %vm298_vm0, %v1629_v58 }
  0x17   : > { %v373_v34 = vpack.c.bf16 %v352_v32, %v351_v31  ;;  %v355_v37 = vld [vmem:[%s1692_s30 + $0xc0] sm:$0xff]  ;;  %v356_v38 = vld [vmem:[%s1692_s30 + $0xc8] sm:$0xff]  ;;  %v374_v39 = vpack.c.bf16 %v354_v36, %v353_v35  ;;  %v357_v41 = vld [vmem:[%s1692_s30 + $0xd0] sm:$0xff]  ;;  %1444 = vmatprep.subr.bf16.mxu0 %v1534_v51  ;;  %1500 = vmatpush3.bf16.msra.mxu1 %v1535_v52  ;;  %309 = vst.msk [vmem:[#allocation2 + $0x50] sm:$0xff] %vm298_vm0, %v1629_v58 }
  0x18   : > { %v375_v40 = vpack.c.bf16 %v356_v38, %v355_v37  ;;  %v358_v42 = vld [vmem:[%s1692_s30 + $0xd8] sm:$0xff]  ;;  %v359_v43 = vld [vmem:[%s1692_s30 + $0xe0] sm:$0xff]  ;;  %v360_v44 = vld [vmem:[%s1692_s30 + $0xe8] sm:$0xff]  ;;  %1493 = vmatprep.subr.bf16.mxu1 %v1536_v53  ;;  %310 = vst.msk [vmem:[#allocation2 + $0x58] sm:$0xff] %vm298_vm0, %v1629_v58 }
  0x19   : > { %v376_v45 = vpack.c.bf16 %v358_v42, %v357_v41  ;;  %v377_v46 = vpack.c.bf16 %v360_v44, %v359_v43  ;;  %v361_v47 = vld [vmem:[%s1692_s30 + $0xf0] sm:$0xff]  ;;  %v362_v48 = vld [vmem:[%s1692_s30 + $0xf8] sm:$0xff]  ;;  %v1540_v57 = vld [vmem:[%s2091_s3] sm:$0xff]   ;;  %311 = vst.msk [vmem:[#allocation2 + $0x60] sm:$0xff] %vm298_vm0, %v1629_v58 }
  0x1a   : > { %v378_v49 = vpack.c.bf16 %v362_v48, %v361_v47  ;;  %1445 = vmatpush3.bf16.msra.mxu0 %v1534_v51  ;;  %312 = vst.msk [vmem:[#allocation2 + $0x68] sm:$0xff] %vm298_vm0, %v1629_v58  ;;  %313 = vst.msk [vmem:[#allocation2 + $0x70] sm:$0xff] %vm298_vm0, %v1629_v58  ;;  %v1801_v59 = vld [vmem:[%s2090_s2] ss:$0 sm:$0xff] }
  0x1b   : > { %1446 = vmatprep.subr.bf16.mxu0 %v1535_v52  ;;  %1501 = vmatpush3.bf16.msra.mxu1 %v1536_v53  ;;  %314 = vst.msk [vmem:[#allocation2 + $0x78] sm:$0xff] %vm298_vm0, %v1629_v58  ;;  %315 = vst.msk [vmem:[#allocation2 + $0x80] sm:$0xff] %vm298_vm0, %v1629_v58 }
  0x1c   : > { %1494 = vmatprep.subr.bf16.mxu1 %v1537_v54  ;;  %316 = vst.msk [vmem:[#allocation2 + $0x88] sm:$0xff] %vm298_vm0, %v1629_v58  ;;  %317 = vst.msk [vmem:[#allocation2 + $0x90] sm:$0xff] %vm298_vm0, %v1629_v58 }
  0x1d   : > { %1415 = vmatmul.mubr.msk.bf16.gmra.mxu0 %vm298_vm0, %v366_v15  ;;  %318 = vst.msk [vmem:[#allocation2 + $0x98] sm:$0xff] %vm298_vm0, %v1629_v58  ;;  %319 = vst.msk [vmem:[#allocation2 + $0xa0] sm:$0xff] %vm298_vm0, %v1629_v58 }
  0x1e   : > { %1418 = vmatprep.mubr.msk.bf16.mxu0 %vm298_vm0, %v367_v16  ;;  %1447 = vmatpush3.bf16.msra.mxu0 %v1535_v52  ;;  %320 = vst.msk [vmem:[#allocation2 + $0xa8] sm:$0xff] %vm298_vm0, %v1629_v58  ;;  %321 = vst.msk [vmem:[#allocation2 + $0xb0] sm:$0xff] %vm298_vm0, %v1629_v58 }
  0x1f   : > { %1448 = vmatprep.subr.bf16.mxu0 %v1536_v53  ;;  %1502 = vmatpush3.bf16.msra.mxu1 %v1537_v54  ;;  %322 = vst.msk [vmem:[#allocation2 + $0xb8] sm:$0xff] %vm298_vm0, %v1629_v58  ;;  %323 = vst.msk [vmem:[#allocation2 + $0xc0] sm:$0xff] %vm298_vm0, %v1629_v58 }
  0x20   : > { %1495 = vmatprep.subr.bf16.mxu1 %v1538_v55  ;;  %324 = vst.msk [vmem:[#allocation2 + $0xc8] sm:$0xff] %vm298_vm0, %v1629_v58  ;;  %325 = vst.msk [vmem:[#allocation2 + $0xd0] sm:$0xff] %vm298_vm0, %v1629_v58 }
  0x21   : > { %326 = vst.msk [vmem:[#allocation2 + $0xd8] sm:$0xff] %vm298_vm0, %v1629_v58  ;;  %327 = vst.msk [vmem:[#allocation2 + $0xe0] sm:$0xff] %vm298_vm0, %v1629_v58 }
  0x22   : > { %1449 = vmatpush3.bf16.msra.mxu0 %v1536_v53  ;;  %328 = vst.msk [vmem:[#allocation2 + $0xe8] sm:$0xff] %vm298_vm0, %v1629_v58  ;;  %329 = vst.msk [vmem:[#allocation2 + $0xf0] sm:$0xff] %vm298_vm0, %v1629_v58 }
  0x23   : > { %1450 = vmatprep.subr.bf16.mxu0 %v1537_v54  ;;  %1503 = vmatpush3.bf16.msra.mxu1 %v1538_v55  ;;  %330 = vst.msk [vmem:[#allocation2 + $0xf8] sm:$0xff] %vm298_vm0, %v1629_v58 }
  0x24   : > { %1496 = vmatprep.subr.bf16.mxu1 %v1539_v56 }
  0x25   : > { %1419 = vmatmul.mubr.msk.bf16.gmra.mxu0 %vm298_vm0, %v368_v21 }
  0x26   : > { %1422 = vmatprep.mubr.msk.bf16.mxu0 %vm298_vm0, %v369_v22  ;;  %1451 = vmatpush3.bf16.msra.mxu0 %v1537_v54 }
  0x27   : > { %1452 = vmatprep.subr.bf16.mxu0 %v1538_v55  ;;  %1504 = vmatpush3.bf16.msra.mxu1 %v1539_v56 }
  0x28   : > { %1497 = vmatprep.subr.bf16.mxu1 %v1540_v57 }
  0x2a   : > { %1453 = vmatpush3.bf16.msra.mxu0 %v1538_v55 }
  0x2b   : > { %1454 = vmatprep.subr.bf16.mxu0 %v1539_v56  ;;  %1505 = vmatpush3.bf16.msra.mxu1 %v1540_v57 }
  0x2d   : > { %1423 = vmatmul.mubr.msk.bf16.gmra.mxu0 %vm298_vm0, %v370_v27 }
  0x2e   : > { %1426 = vmatprep.mubr.msk.bf16.mxu0 %vm298_vm0, %v371_v28  ;;  %1455 = vmatpush3.bf16.msra.mxu0 %v1539_v56 }
  0x2f   : > { %1456 = vmatprep.subr.bf16.mxu0 %v1540_v57 }
  0x32   : > { %1457 = vmatpush3.bf16.msra.mxu0 %v1540_v57 }
  0x35   : > { %1427 = vmatmul.mubr.msk.bf16.gmra.mxu0 %vm298_vm0, %v372_v33 }
  0x36   : > { %1430 = vmatprep.mubr.msk.bf16.mxu0 %vm298_vm0, %v373_v34 }
  0x3d   : > { %1431 = vmatmul.mubr.msk.bf16.gmra.mxu0 %vm298_vm0, %v374_v39 }
  0x3e   : > { %1434 = vmatprep.mubr.msk.bf16.mxu0 %vm298_vm0, %v375_v40 }
  0x45   : > { %1435 = vmatmul.mubr.msk.bf16.gmra.mxu0 %vm298_vm0, %v376_v45 }
  0x46   : > { %1438 = vmatprep.mubr.msk.bf16.mxu0 %vm298_vm0, %v377_v46 }
  0x4d   : > { %1439 = vmatmul.mubr.msk.bf16.gmra.mxu0 %vm298_vm0, %v378_v49 }
  0xd5   : > { %v1412_v60 = vpop.f32.mrf.mxu0 }
  0xd6   : > { %v494_v61 = vadd.f32 %v1412_v60, %v1801_v59 }
  0xd7   : > { %v485_v62 = vpop.f32.mrf.mxu0 }
  0xd8   : > { %v486_v63 = vadd.f32 %v1801_v59, %v485_v62  ;;  %v646_v0 = vmul.f32 0.70710677, %v494_v61  ;;  %v614_v44 = vmul.f32 0.5, %v494_v61 }
  0xd9   : > { %v1413_v1 = vpop.f32.mrf.mxu0 }
  0xda   : > { %v644_v2 = vmul.f32 0.70710677, %v486_v63  ;;  %v497_v3 = vadd.f32 %v1413_v1, %v1801_v59  ;;  %v612_v30 = vmul.f32 0.5, %v486_v63 }
  0xdb   : > { %v488_v4 = vpop.f32.mrf.mxu0 }
  0xdc   : > { %1541 = verf.f32 %v644_v2  ;;  %v647_v5 = vmul.f32 0.70710677, %v497_v3  ;;  %v489_v6 = vadd.f32 %v1801_v59, %v488_v4  ;;  %v615_v38 = vmul.f32 0.5, %v497_v3 }
  0xdd   : > { %1543 = verf.f32 %v646_v0  ;;  %v1416_v7 = vpop.f32.mrf.mxu0 }
  0xde   : > { %1545 = verf.f32 %v647_v5  ;;  %v645_v8 = vmul.f32 0.70710677, %v489_v6  ;;  %v1808_v9 = vadd.f32 %v1416_v7, %v1801_v59  ;;  %v613_v41 = vmul.f32 0.5, %v489_v6 }
  0xdf   : > { %v501_v10 = vpop.f32.mrf.mxu0 }
  0xe0   : > { %1547 = verf.f32 %v645_v8  ;;  %v650_v11 = vmul.f32 0.70710677, %v1808_v9  ;;  %v1812_v12 = vadd.f32 %v1801_v59, %v501_v10 }
  0xe1   : > { %v1417_v13 = vpop.f32.mrf.mxu0 }
  0xe2   : > { %v648_v14 = vmul.f32 0.70710677, %v1812_v12  ;;  %v1816_v15 = vadd.f32 %v1417_v13, %v1801_v59  ;;  %1549 = verf.f32 %v650_v11  ;;  %v616_v8 = vmul.f32 0.5, %v1812_v12 }
  0xe3   : > { %v504_v16 = vpop.f32.mrf.mxu0 }
  0xe4   : > { %v651_v17 = vmul.f32 0.70710677, %v1816_v15  ;;  %v1820_v18 = vadd.f32 %v1801_v59, %v504_v16  ;;  %1551 = verf.f32 %v648_v14  ;;  %v619_v6 = vmul.f32 0.5, %v1816_v15 }
  0xe5   : > { %v1420_v19 = vpop.f32.mrf.mxu0  ;;  %v618_v16 = vmul.f32 0.5, %v1808_v9 }
  0xe6   : > { %1553 = verf.f32 %v651_v17  ;;  %v649_v20 = vmul.f32 0.70710677, %v1820_v18  ;;  %v1824_v21 = vadd.f32 %v1420_v19, %v1801_v59  ;;  %v617_v10 = vmul.f32 0.5, %v1820_v18 }
  0xe7   : > { %v517_v22 = vpop.f32.mrf.mxu0 }
  0xe8   : > { %1555 = verf.f32 %v649_v20  ;;  %v654_v23 = vmul.f32 0.70710677, %v1824_v21  ;;  %v1828_v25 = vadd.f32 %v1801_v59, %v517_v22 }
  0xe9   : > { %v1542_v24 = vpop.eup %1541  ;;  %v1421_v26 = vpop.f32.mrf.mxu0 }
  0xea   : > { %v1544_v27 = vpop.eup %1543  ;;  %v1831_v28 = vadd.f32 %v1421_v26, %v1801_v59  ;;  %v652_v31 = vmul.f32 0.70710677, %v1828_v25  ;;  %v708_v33 = vadd.f32 1.0, %v1542_v24  ;;  %1557 = verf.f32 %v654_v23 }
  0xeb   : > { %v1546_v29 = vpop.eup %1545  ;;  %v520_v32 = vpop.f32.mrf.mxu0  ;;  %v710_v37 = vadd.f32 1.0, %v1544_v27 }
  0xec   : > { %v711_v34 = vadd.f32 1.0, %v1546_v29  ;;  %v655_v35 = vmul.f32 0.70710677, %v1831_v28  ;;  %1559 = verf.f32 %v652_v31  ;;  %v1836_v39 = vadd.f32 %v1801_v59, %v520_v32 }
  0xed   : > { %v1548_v36 = vpop.eup %1547  ;;  %v1424_v40 = vpop.f32.mrf.mxu0  ;;  %v740_v48 = vmul.f32 %v708_v33, %v612_v30  ;;  %v742_v51 = vmul.f32 %v710_v37, %v614_v44 }
  0xee   : > { %v709_v42 = vadd.f32 1.0, %v1548_v36  ;;  %1561 = verf.f32 %v655_v35  ;;  %v1839_v43 = vadd.f32 %v1424_v40, %v1801_v59  ;;  %v743_v45 = vmul.f32 %v711_v34, %v615_v38 }
  0xef   : > { %v653_v46 = vmul.f32 0.70710677, %v1836_v39  ;;  %v533_v47 = vpop.f32.mrf.mxu0  ;;  %v1550_v50 = vpop.eup %1549  ;;  %v623_v40 = vmul.f32 0.5, %v1831_v28  ;;  %v621_v44 = vmul.f32 0.5, %v1836_v39 }
  0xf0   : > { %v741_v49 = vmul.f32 %v709_v42, %v613_v41  ;;  %v658_v52 = vmul.f32 0.70710677, %v1839_v43  ;;  %v1844_v53 = vadd.f32 %v1801_v59, %v533_v47  ;;  %v805_v60 = vpack.c.bf16 %v743_v45, %v742_v51 }
  0xf1   : > { %1563 = verf.f32 %v653_v46  ;;  %v1425_v54 = vpop.f32.mrf.mxu0  ;;  %v1552_v55 = vpop.eup %1551  ;;  %v714_v5 = vadd.f32 1.0, %v1550_v50  ;;  %v620_v42 = vmul.f32 0.5, %v1828_v25 }
  0xf2   : > { %v1847_v56 = vadd.f32 %v1425_v54, %v1801_v59  ;;  %v804_v57 = vpack.c.bf16 %v741_v49, %v740_v48  ;;  %v656_v61 = vmul.f32 0.70710677, %v1844_v53  ;;  %1565 = verf.f32 %v658_v52 }
  0xf3   : > { %v1554_v58 = vpop.eup %1553  ;;  %v536_v62 = vpop.f32.mrf.mxu0  ;;  %v712_v4 = vadd.f32 1.0, %v1552_v55  ;;  %v746_v18 = vmul.f32 %v714_v5, %v618_v16  ;;  %v622_v48 = vmul.f32 0.5, %v1824_v21 }
  0xf4   : > { %v715_v63 = vadd.f32 1.0, %v1554_v58  ;;  %v659_v0 = vmul.f32 0.70710677, %v1847_v56  ;;  %v1852_v1 = vadd.f32 %v1801_v59, %v536_v62  ;;  %1458 = vmatprep.mubr.bf16.mxu0 %v804_v57  ;;  %1567 = verf.f32 %v656_v61 }
  0xf5   : > { %v1556_v2 = vpop.eup %1555  ;;  %v1428_v3 = vpop.f32.mrf.mxu0  ;;  %1459 = vmatmul.mubr.bf16.vlgmr.msra.gmra.mxu0 %v805_v60  ;;  %v744_v23 = vmul.f32 %v712_v4, %v616_v8  ;;  %v627_v21 = vmul.f32 0.5, %v1847_v56 }
  0xf6   : > { %1569 = verf.f32 %v659_v0  ;;  %v657_v7 = vmul.f32 0.70710677, %v1852_v1  ;;  %v1859_v11 = vadd.f32 %v1428_v3, %v1801_v59  ;;  %v713_v14 = vadd.f32 1.0, %v1556_v2 }
  0xf7   : > { %v549_v13 = vpop.f32.mrf.mxu0  ;;  %v747_v17 = vmul.f32 %v715_v63, %v619_v6  ;;  %v1558_v15 = vpop.eup %1557  ;;  %v625_v5 = vmul.f32 0.5, %v1852_v1  ;;  %v626_v1 = vmul.f32 0.5, %v1839_v43 }
  0xf8   : > { %1571 = verf.f32 %v657_v7  ;;  %v1863_v19 = vadd.f32 %v1801_v59, %v549_v13  ;;  %v662_v20 = vmul.f32 0.70710677, %v1859_v11  ;;  %v745_v12 = vmul.f32 %v713_v14, %v617_v10 }
  0xf9   : > { %v1429_v22 = vpop.f32.mrf.mxu0  ;;  %v1560_v24 = vpop.eup %1559  ;;  %v807_v33 = vpack.c.bf16 %v747_v17, %v746_v18  ;;  %v718_v38 = vadd.f32 1.0, %v1558_v15  ;;  %v624_v13 = vmul.f32 0.5, %v1844_v53 }
  0xfa   : > { %v660_v26 = vmul.f32 0.70710677, %v1863_v19  ;;  %v1868_v27 = vadd.f32 %v1429_v22, %v1801_v59  ;;  %v806_v30 = vpack.c.bf16 %v745_v12, %v744_v23  ;;  %1573 = verf.f32 %v662_v20 }
  0xfb   : > { %v1562_v29 = vpop.eup %1561  ;;  %v552_v9 = vpop.f32.mrf.mxu0  ;;  %v716_v34 = vadd.f32 1.0, %v1560_v24  ;;  %v750_v57 = vmul.f32 %v718_v38, %v622_v48 }
  0xfc   : > { %v719_v31 = vadd.f32 1.0, %v1562_v29  ;;  %v663_v32 = vmul.f32 0.70710677, %v1868_v27  ;;  %1575 = verf.f32 %v660_v26  ;;  %v1872_v35 = vadd.f32 %v1801_v59, %v552_v9  ;;  %1462 = vmatprep.mubr.bf16.mxu1 %v806_v30 }
  0xfd   : > { %v1432_v36 = vpop.f32.mrf.mxu0  ;;  %1463 = vmatmul.mubr.bf16.vlgmr.msra.gmra.mxu1 %v807_v33  ;;  %v748_v52 = vmul.f32 %v716_v34, %v620_v42 }
  0xfe   : > { %v1564_v37 = vpop.eup %1563  ;;  %1577 = verf.f32 %v663_v32  ;;  %v1876_v41 = vadd.f32 %v1432_v36, %v1801_v59  ;;  %v661_v46 = vmul.f32 0.70710677, %v1872_v35  ;;  %v751_v49 = vmul.f32 %v719_v31, %v623_v40 }
  0xff   : > { %v717_v45 = vadd.f32 1.0, %v1564_v37  ;;  %v565_v47 = vpop.f32.mrf.mxu0  ;;  %v1566_v51 = vpop.eup %1565  ;;  %v631_v36 = vmul.f32 0.5, %v1868_v27 }
 0x100   : > { %v666_v50 = vmul.f32 0.70710677, %v1876_v41  ;;  %v1884_v28 = vadd.f32 %v1801_v59, %v565_v47  ;;  %1579 = verf.f32 %v661_v46  ;;  %v809_v2 = vpack.c.bf16 %v751_v49, %v750_v57 }
 0x101   : > { %v749_v54 = vmul.f32 %v717_v45, %v621_v44  ;;  %v1433_v55 = vpop.f32.mrf.mxu0  ;;  %v1568_v25 = vpop.eup %1567  ;;  %v722_v8 = vadd.f32 1.0, %v1566_v51  ;;  %v628_v46 = vmul.f32 0.5, %v1863_v19  ;;  %v629_v47 = vmul.f32 0.5, %v1872_v35 }
 0x102   : > { %v664_v39 = vmul.f32 0.70710677, %v1884_v28  ;;  %v1888_v58 = vadd.f32 %v1433_v55, %v1801_v59  ;;  %1581 = verf.f32 %v666_v50  ;;  %v720_v4 = vadd.f32 1.0, %v1568_v25 }
 0x103   : > { %v1570_v60 = vpop.eup %1569  ;;  %v568_v61 = vpop.f32.mrf.mxu0  ;;  %v808_v62 = vpack.c.bf16 %v749_v54, %v748_v52  ;;  %v754_v18 = vmul.f32 %v722_v8, %v626_v1  ;;  %v630_v49 = vmul.f32 0.5, %v1859_v11  ;;  %v632_v8 = vmul.f32 0.5, %v1884_v28 }
 0x104   : > { %v723_v63 = vadd.f32 1.0, %v1570_v60  ;;  %v667_v0 = vmul.f32 0.70710677, %v1888_v58  ;;  %1583 = verf.f32 %v664_v39  ;;  %v1894_v6 = vadd.f32 %v1801_v59, %v568_v61 }
 0x105   : > { %v1572_v3 = vpop.eup %1571  ;;  %1466 = vmatprep.mubr.bf16.mxu1 %v808_v62  ;;  %v1436_v7 = vpop.f32.mrf.mxu0  ;;  %v752_v23 = vmul.f32 %v720_v4, %v624_v13 }
 0x106   : > { %v721_v10 = vadd.f32 1.0, %v1572_v3  ;;  %1585 = verf.f32 %v667_v0  ;;  %v1897_v56 = vadd.f32 %v1436_v7, %v1801_v59  ;;  %1467 = vmatmul.mubr.bf16.gmra.mxu1 %v809_v2  ;;  %v665_v14 = vmul.f32 0.70710677, %v1894_v6 }
 0x107   : > { %v581_v16 = vpop.f32.mrf.mxu0  ;;  %v755_v17 = vmul.f32 %v723_v63, %v627_v21  ;;  %v1574_v22 = vpop.eup %1573  ;;  %v635_v7 = vmul.f32 0.5, %v1888_v58 }
 0x108   : > { %v753_v15 = vmul.f32 %v721_v10, %v625_v5  ;;  %v1903_v20 = vadd.f32 %v1801_v59, %v581_v16  ;;  %1587 = verf.f32 %v665_v14  ;;  %v670_v26 = vmul.f32 0.70710677, %v1897_v56 }
 0x109   : > { %v1437_v12 = vpop.f32.mrf.mxu0  ;;  %v1576_v24 = vpop.eup %1575  ;;  %v811_v33 = vpack.c.bf16 %v755_v17, %v754_v18  ;;  %v726_v42 = vadd.f32 1.0, %v1574_v22  ;;  %v633_v10 = vmul.f32 0.5, %v1894_v6  ;;  %v634_v16 = vmul.f32 0.5, %v1876_v41 }
 0x10a   : > { %v668_v53 = vmul.f32 0.70710677, %v1903_v20  ;;  %v1908_v9 = vadd.f32 %v1437_v12, %v1801_v59  ;;  %v810_v30 = vpack.c.bf16 %v753_v15, %v752_v23  ;;  %v724_v34 = vadd.f32 1.0, %v1576_v24 }
 0x10b   : > { %v1578_v29 = vpop.eup %1577  ;;  %v584_v43 = vpop.f32.mrf.mxu0  ;;  %v758_v19 = vmul.f32 %v726_v42, %v630_v49  ;;  %v636_v28 = vmul.f32 0.5, %v1903_v20 }
 0x10c   : > { %v727_v31 = vadd.f32 1.0, %v1578_v29  ;;  %1589 = verf.f32 %v668_v53  ;;  %v1911_v32 = vadd.f32 %v1801_v59, %v584_v43  ;;  %v671_v37 = vmul.f32 0.70710677, %v1908_v9  ;;  %1470 = vmatprep.mubr.bf16.mxu1 %v810_v30 }
 0x10d   : > { %v1440_v38 = vpop.f32.mrf.mxu0  ;;  %v1580_v40 = vpop.eup %1579  ;;  %1591 = verf.f32 %v670_v26  ;;  %v756_v54 = vmul.f32 %v724_v34, %v628_v46  ;;  %v639_v29 = vmul.f32 0.5, %v1908_v9  ;;  %v638_v30 = vmul.f32 0.5, %v1897_v56 }
 0x10e   : > { %v669_v44 = vmul.f32 0.70710677, %v1911_v32  ;;  %v1917_v45 = vadd.f32 %v1440_v38, %v1801_v59  ;;  %1471 = vmatmul.mubr.bf16.gmra.mxu1 %v811_v33  ;;  %v725_v48 = vadd.f32 1.0, %v1580_v40  ;;  %1593 = verf.f32 %v671_v37 }
 0x10f   : > { %v597_v27 = vpop.f32.mrf.mxu0  ;;  %v759_v50 = vmul.f32 %v727_v31, %v631_v36  ;;  %v1582_v52 = vpop.eup %1581  ;;  %v637_v41 = vmul.f32 0.5, %v1911_v32 }
 0x110   : > { %1595 = verf.f32 %v669_v44  ;;  %v674_v51 = vmul.f32 0.70710677, %v1917_v45  ;;  %v757_v55 = vmul.f32 %v725_v48, %v629_v47  ;;  %v1924_v25 = vadd.f32 %v1801_v59, %v597_v27 }
 0x111   : > { %v1441_v57 = vpop.f32.mrf.mxu0  ;;  %v1584_v39 = vpop.eup %1583  ;;  %v813_v0 = vpack.c.bf16 %v759_v50, %v758_v19  ;;  %v730_v5 = vadd.f32 1.0, %v1582_v52  ;;  %v642_v49 = vmul.f32 0.5, %v1917_v45  ;;  %v773_v45 = vld [vmem:[#allocation2 + $0x8] sm:$0xff] }
 0x112   : > { %v609_v35 = vadd.f32 %v1441_v57, %v1801_v59  ;;  %v672_v21 = vmul.f32 0.70710677, %v1924_v25  ;;  %v812_v11 = vpack.c.bf16 %v757_v55, %v756_v54  ;;  %1597 = verf.f32 %v674_v51 }
 0x113   : > { %v1586_v60 = vpop.eup %1585  ;;  %v600_v61 = vpop.f32.mrf.mxu0  ;;  %v728_v2 = vadd.f32 1.0, %v1584_v39  ;;  %v640_v32 = vmul.f32 0.5, %v1924_v25  ;;  %v774_v39 = vld [vmem:[#allocation2 + $0x10] sm:$0xff] }
 0x114   : > { %v731_v62 = vadd.f32 1.0, %v1586_v60  ;;  %v675_v63 = vmul.f32 0.70710677, %v609_v35  ;;  %1599 = verf.f32 %v672_v21  ;;  %v601_v3 = vadd.f32 %v1801_v59, %v600_v61  ;;  %1474 = vmatprep.mubr.bf16.mxu1 %v812_v11  ;;  %v772_v60 = vld [vmem:[#allocation2] sm:$0xff]  ;;  %v775_v61 = vld [vmem:[#allocation2 + $0x18] sm:$0xff] }
 0x115   : > { %v1588_v4 = vpop.eup %1587  ;;  %v760_v15 = vmul.f32 %v728_v2, %v632_v8  ;;  %v762_v59 = vmul.f32 %v730_v5, %v634_v16  ;;  %v643_v48 = vmul.f32 0.5, %v609_v35  ;;  %v778_v2 = vld [vmem:[#allocation2 + $0x30] sm:$0xff]  ;;  %v776_v5 = vld [vmem:[#allocation2 + $0x20] sm:$0xff] }
 0x116   : > { %1601 = verf.f32 %v675_v63  ;;  %1475 = vmatmul.mubr.bf16.gmra.mxu1 %v813_v0  ;;  %v729_v13 = vadd.f32 1.0, %v1588_v4  ;;  %v673_v14 = vmul.f32 0.70710677, %v601_v3  ;;  %v763_v1 = vmul.f32 %v731_v62, %v635_v7 }
 0x117   : > { %v641_v27 = vmul.f32 0.5, %v601_v3  ;;  %v1945_v3 = vld [vmem:[%s2092_s4] ss:$0 sm:$0xff] }
 0x118   : > { %v761_v22 = vmul.f32 %v729_v13, %v633_v10  ;;  %1603 = verf.f32 %v673_v14  ;;  %v815_v18 = vpack.c.bf16 %v763_v1, %v762_v59  ;;  %v779_v14 = vld [vmem:[#allocation2 + $0x38] sm:$0xff] }
 0x119   : > { %v1590_v17 = vpop.eup %1589 }
 0x11a   : > { %v1592_v23 = vpop.eup %1591  ;;  %v814_v12 = vpack.c.bf16 %v761_v22, %v760_v15  ;;  %v732_v58 = vadd.f32 1.0, %v1590_v17  ;;  %v777_v22 = vld [vmem:[#allocation2 + $0x28] sm:$0xff] }
 0x11b   : > { %v1594_v24 = vpop.eup %1593  ;;  %v734_v6 = vadd.f32 1.0, %v1592_v23 }
 0x11c   : > { %v735_v53 = vadd.f32 1.0, %v1594_v24  ;;  %1478 = vmatprep.mubr.bf16.mxu1 %v814_v12  ;;  %v764_v31 = vmul.f32 %v732_v58, %v636_v28  ;;  %v782_v58 = vld [vmem:[#allocation2 + $0x50] sm:$0xff] }
 0x11d   : > { %v1596_v26 = vpop.eup %1595  ;;  %v766_v38 = vmul.f32 %v734_v6, %v638_v30  ;;  %v780_v6 = vld [vmem:[#allocation2 + $0x40] sm:$0xff]  ;;  %v783_v30 = vld [vmem:[#allocation2 + $0x58] sm:$0xff] }
 0x11e   : > { %v733_v43 = vadd.f32 1.0, %v1596_v26  ;;  %1479 = vmatmul.mubr.bf16.gmra.mxu1 %v815_v18  ;;  %v767_v33 = vmul.f32 %v735_v53, %v639_v29 }
 0x11f   : > { %v1598_v36 = vpop.eup %1597 }
 0x120   : > { %v765_v34 = vmul.f32 %v733_v43, %v637_v41  ;;  %v817_v44 = vpack.c.bf16 %v767_v33, %v766_v38  ;;  %v738_v9 = vadd.f32 1.0, %v1598_v36 }
 0x121   : > { %v1600_v37 = vpop.eup %1599 }
 0x122   : > { %v816_v40 = vpack.c.bf16 %v765_v34, %v764_v31  ;;  %v736_v46 = vadd.f32 1.0, %v1600_v37  ;;  %v770_v54 = vmul.f32 %v738_v9, %v642_v49  ;;  %v781_v37 = vld [vmem:[#allocation2 + $0x48] sm:$0xff] }
 0x123   : > { %v1602_v42 = vpop.eup %1601 }
 0x124   : > { %v739_v20 = vadd.f32 1.0, %v1602_v42  ;;  %1482 = vmatprep.mubr.bf16.mxu1 %v816_v40  ;;  %v768_v51 = vmul.f32 %v736_v46, %v640_v32  ;;  %v784_v32 = vld [vmem:[#allocation2 + $0x60] sm:$0xff] }
 0x125   : > { %v1604_v47 = vpop.eup %1603 }
 0x126   : > { %1483 = vmatmul.mubr.bf16.gmra.mxu1 %v817_v44  ;;  %v737_v56 = vadd.f32 1.0, %v1604_v47  ;;  %v771_v50 = vmul.f32 %v739_v20, %v643_v48  ;;  %v786_v44 = vld [vmem:[#allocation2 + $0x70] sm:$0xff] }
 0x128   : > { %v769_v52 = vmul.f32 %v737_v56, %v641_v27  ;;  %v819_v57 = vpack.c.bf16 %v771_v50, %v770_v54 }
 0x12a   : > { %v818_v55 = vpack.c.bf16 %v769_v52, %v768_v51  ;;  %v787_v51 = vld [vmem:[#allocation2 + $0x78] sm:$0xff] }
 0x12c   : > { %1486 = vmatprep.mubr.bf16.mxu1 %v818_v55 }
 0x12e   : > { %1487 = vmatmul.mubr.bf16.gmra.mxu1 %v819_v57 }
 0x1b5   : > { %v1460_v19 = vpop.f32.mrf.mxu0 }
 0x1b6   : > { %v1047_v21 = vadd.f32 %v1460_v19, %v774_v39  ;;  %v785_v39 = vld [vmem:[#allocation2 + $0x68] sm:$0xff] }
 0x1b7   : > { %v918_v35 = vpop.f32.mrf.mxu0 }
 0x1b8   : > { %1079 = vst.msk [vmem:[#allocation2 + $0x10] sm:$0xff] %vm298_vm0, %v1047_v21  ;;  %v1045_v25 = vadd.f32 %v918_v35, %v772_v60 }
 0x1b9   : > { %v1461_v11 = vpop.f32.mrf.mxu0 }
 0x1ba   : > { %1077 = vst.msk [vmem:[#allocation2] sm:$0xff] %vm298_vm0, %v1045_v25  ;;  %v1048_v62 = vadd.f32 %v1461_v11, %v775_v61  ;;  %v790_v61 = vld [vmem:[#allocation2 + $0x90] sm:$0xff] }
 0x1bb   : > { %v921_v63 = vpop.f32.mrf.mxu0 }
 0x1bc   : > { %1080 = vst.msk [vmem:[#allocation2 + $0x18] sm:$0xff] %vm298_vm0, %v1048_v62  ;;  %v1046_v0 = vadd.f32 %v921_v63, %v773_v45  ;;  %v788_v63 = vld [vmem:[#allocation2 + $0x80] sm:$0xff] }
 0x1bd   : > { %v1464_v4 = vpop.f32.mrf.mxu1 }
 0x1be   : > { %1078 = vst.msk [vmem:[#allocation2 + $0x8] sm:$0xff] %vm298_vm0, %v1046_v0  ;;  %v1051_v8 = vadd.f32 %v1464_v4, %v778_v2 }
 0x1bf   : > { %v1114_v7 = vld [vmem:[#allocation2 + $0x10] sm:$0xff]  ;;  %v934_v13 = vpop.f32.mrf.mxu1 }
 0x1c0   : > { %v1153_v10 = vadd.f32 %v1945_v3, %v1114_v7  ;;  %1083 = vst.msk [vmem:[#allocation2 + $0x30] sm:$0xff] %vm298_vm0, %v1051_v8  ;;  %v1049_v1 = vadd.f32 %v934_v13, %v776_v5  ;;  %v791_v7 = vld [vmem:[#allocation2 + $0x98] sm:$0xff] }
 0x1c1   : > { %v1112_v16 = vld [vmem:[#allocation2] sm:$0xff]  ;;  %v1465_v15 = vpop.f32.mrf.mxu1 }
 0x1c2   : > { %1185 = vst.msk [vmem:[%s1953_s8 + $0x10] sm:$0xff] %vm298_vm0, %v1153_v10  ;;  %v1151_v17 = vadd.f32 %v1945_v3, %v1112_v16  ;;  %1081 = vst.msk [vmem:[#allocation2 + $0x20] sm:$0xff] %vm298_vm0, %v1049_v1  ;;  %v1052_v23 = vadd.f32 %v1465_v15, %v779_v14  ;;  %v789_v16 = vld [vmem:[#allocation2 + $0x88] sm:$0xff] }
 0x1c3   : > { %v1115_v59 = vld [vmem:[#allocation2 + $0x18] sm:$0xff]  ;;  %v937_v24 = vpop.f32.mrf.mxu1 }
 0x1c4   : > { %1183 = vst.msk [vmem:[%s1953_s8] sm:$0xff] %vm298_vm0, %v1151_v17  ;;  %v1154_v12 = vadd.f32 %v1945_v3, %v1115_v59  ;;  %1084 = vst.msk [vmem:[#allocation2 + $0x38] sm:$0xff] %vm298_vm0, %v1052_v23  ;;  %v1050_v26 = vadd.f32 %v937_v24, %v777_v22  ;;  %v794_v59 = vld [vmem:[#allocation2 + $0xb0] sm:$0xff] }
 0x1c5   : > { %v1113_v18 = vld [vmem:[#allocation2 + $0x8] sm:$0xff] }
 0x1c6   : > { %1186 = vst.msk [vmem:[%s1953_s8 + $0x18] sm:$0xff] %vm298_vm0, %v1154_v12  ;;  %v1152_v28 = vadd.f32 %v1945_v3, %v1113_v18  ;;  %v1468_v53 = vpop.f32.mrf.mxu1  ;;  %1082 = vst.msk [vmem:[#allocation2 + $0x28] sm:$0xff] %vm298_vm0, %v1050_v26  ;;  %v792_v18 = vld [vmem:[#allocation2 + $0xa0] sm:$0xff] }
 0x1c7   : > { %v1055_v29 = vadd.f32 %v1468_v53, %v782_v58  ;;  %v1118_v41 = vld [vmem:[#allocation2 + $0x30] sm:$0xff] }
 0x1c8   : > { %1184 = vst.msk [vmem:[%s1953_s8 + $0x8] sm:$0xff] %vm298_vm0, %v1152_v28  ;;  %v950_v43 = vpop.f32.mrf.mxu1  ;;  %v1157_v31 = vadd.f32 %v1945_v3, %v1118_v41 }
 0x1c9   : > { %1087 = vst.msk [vmem:[#allocation2 + $0x50] sm:$0xff] %vm298_vm0, %v1055_v29  ;;  %v1053_v33 = vadd.f32 %v950_v43, %v780_v6  ;;  %v1116_v34 = vld [vmem:[#allocation2 + $0x20] sm:$0xff]  ;;  %v795_v29 = vld [vmem:[#allocation2 + $0xb8] sm:$0xff] }
 0x1ca   : > { %v1469_v36 = vpop.f32.mrf.mxu1  ;;  %1189 = vst.msk [vmem:[%s1953_s8 + $0x30] sm:$0xff] %vm298_vm0, %v1157_v31  ;;  %v1155_v38 = vadd.f32 %v1945_v3, %v1116_v34 }
 0x1cb   : > { %1085 = vst.msk [vmem:[#allocation2 + $0x40] sm:$0xff] %vm298_vm0, %v1053_v33  ;;  %v1056_v40 = vadd.f32 %v1469_v36, %v783_v30  ;;  %v1119_v42 = vld [vmem:[#allocation2 + $0x38] sm:$0xff]  ;;  %v793_v33 = vld [vmem:[#allocation2 + $0xa8] sm:$0xff] }
 0x1cc   : > { %v953_v20 = vpop.f32.mrf.mxu1  ;;  %1187 = vst.msk [vmem:[%s1953_s8 + $0x20] sm:$0xff] %vm298_vm0, %v1155_v38  ;;  %v1158_v46 = vadd.f32 %v1945_v3, %v1119_v42 }
 0x1cd   : > { %1088 = vst.msk [vmem:[#allocation2 + $0x58] sm:$0xff] %vm298_vm0, %v1056_v40  ;;  %v1054_v47 = vadd.f32 %v953_v20, %v781_v37  ;;  %v1117_v9 = vld [vmem:[#allocation2 + $0x28] sm:$0xff]  ;;  %v798_v40 = vld [vmem:[#allocation2 + $0xd0] sm:$0xff] }
 0x1ce   : > { %v1472_v48 = vpop.f32.mrf.mxu1  ;;  %1190 = vst.msk [vmem:[%s1953_s8 + $0x38] sm:$0xff] %vm298_vm0, %v1158_v46  ;;  %v1156_v27 = vadd.f32 %v1945_v3, %v1117_v9 }
 0x1cf   : > { %1086 = vst.msk [vmem:[#allocation2 + $0x48] sm:$0xff] %vm298_vm0, %v1054_v47  ;;  %v1059_v56 = vadd.f32 %v1472_v48, %v786_v44  ;;  %v796_v47 = vld [vmem:[#allocation2 + $0xc0] sm:$0xff] }
 0x1d0   : > { %v1122_v49 = vld [vmem:[#allocation2 + $0x50] sm:$0xff]  ;;  %v966_v50 = vpop.f32.mrf.mxu1  ;;  %1188 = vst.msk [vmem:[%s1953_s8 + $0x28] sm:$0xff] %vm298_vm0, %v1156_v27 }
 0x1d1   : > { %v1161_v52 = vadd.f32 %v1945_v3, %v1122_v49  ;;  %1091 = vst.msk [vmem:[#allocation2 + $0x70] sm:$0xff] %vm298_vm0, %v1059_v56  ;;  %v1057_v54 = vadd.f32 %v966_v50, %v784_v32  ;;  %v799_v56 = vld [vmem:[#allocation2 + $0xd8] sm:$0xff] }
 0x1d2   : > { %v1120_v55 = vld [vmem:[#allocation2 + $0x40] sm:$0xff]  ;;  %v1473_v57 = vpop.f32.mrf.mxu1 }
 0x1d3   : > { %1193 = vst.msk [vmem:[%s1953_s8 + $0x50] sm:$0xff] %vm298_vm0, %v1161_v52  ;;  %v1159_v19 = vadd.f32 %v1945_v3, %v1120_v55  ;;  %1089 = vst.msk [vmem:[#allocation2 + $0x60] sm:$0xff] %vm298_vm0, %v1057_v54  ;;  %v1060_v60 = vadd.f32 %v1473_v57, %v787_v51  ;;  %v797_v54 = vld [vmem:[#allocation2 + $0xc8] sm:$0xff] }
 0x1d4   : > { %v1123_v21 = vld [vmem:[#allocation2 + $0x58] sm:$0xff]  ;;  %v969_v35 = vpop.f32.mrf.mxu1 }
 0x1d5   : > { %1191 = vst.msk [vmem:[%s1953_s8 + $0x40] sm:$0xff] %vm298_vm0, %v1159_v19  ;;  %v1162_v25 = vadd.f32 %v1945_v3, %v1123_v21  ;;  %1092 = vst.msk [vmem:[#allocation2 + $0x78] sm:$0xff] %vm298_vm0, %v1060_v60  ;;  %v1058_v11 = vadd.f32 %v969_v35, %v785_v39  ;;  %v802_v60 = vld [vmem:[#allocation2 + $0xf0] sm:$0xff] }
 0x1d6   : > { %v1121_v45 = vld [vmem:[#allocation2 + $0x48] sm:$0xff]  ;;  %v1476_v62 = vpop.f32.mrf.mxu1 }
 0x1d7   : > { %1194 = vst.msk [vmem:[%s1953_s8 + $0x58] sm:$0xff] %vm298_vm0, %v1162_v25  ;;  %v1160_v0 = vadd.f32 %v1945_v3, %v1121_v45  ;;  %1090 = vst.msk [vmem:[#allocation2 + $0x68] sm:$0xff] %vm298_vm0, %v1058_v11  ;;  %v1063_v2 = vadd.f32 %v1476_v62, %v790_v61  ;;  %v800_v11 = vld [vmem:[#allocation2 + $0xe0] sm:$0xff] }
 0x1d8   : > { %v1126_v4 = vld [vmem:[#allocation2 + $0x70] sm:$0xff]  ;;  %v982_v5 = vpop.f32.mrf.mxu1 }
 0x1d9   : > { %1192 = vst.msk [vmem:[%s1953_s8 + $0x48] sm:$0xff] %vm298_vm0, %v1160_v0  ;;  %v1165_v8 = vadd.f32 %v1945_v3, %v1126_v4  ;;  %1095 = vst.msk [vmem:[#allocation2 + $0x90] sm:$0xff] %vm298_vm0, %v1063_v2  ;;  %v1061_v10 = vadd.f32 %v982_v5, %v788_v63  ;;  %v803_v2 = vld [vmem:[#allocation2 + $0xf8] sm:$0xff] }
 0x1da   : > { %v1124_v13 = vld [vmem:[#allocation2 + $0x60] sm:$0xff]  ;;  %v1477_v14 = vpop.f32.mrf.mxu1 }
 0x1db   : > { %1197 = vst.msk [vmem:[%s1953_s8 + $0x70] sm:$0xff] %vm298_vm0, %v1165_v8  ;;  %v1163_v1 = vadd.f32 %v1945_v3, %v1124_v13  ;;  %1093 = vst.msk [vmem:[#allocation2 + $0x80] sm:$0xff] %vm298_vm0, %v1061_v10  ;;  %v1064_v17 = vadd.f32 %v1477_v14, %v791_v7  ;;  %v801_v10 = vld [vmem:[#allocation2 + $0xe8] sm:$0xff] }
 0x1dc   : > { %v1127_v15 = vld [vmem:[#allocation2 + $0x78] sm:$0xff]  ;;  %v985_v22 = vpop.f32.mrf.mxu1 }
 0x1dd   : > { %1195 = vst.msk [vmem:[%s1953_s8 + $0x60] sm:$0xff] %vm298_vm0, %v1163_v1  ;;  %v1166_v23 = vadd.f32 %v1945_v3, %v1127_v15  ;;  %1096 = vst.msk [vmem:[#allocation2 + $0x98] sm:$0xff] %vm298_vm0, %v1064_v17  ;;  %v1062_v12 = vadd.f32 %v985_v22, %v789_v16 }
 0x1de   : > { %v1125_v24 = vld [vmem:[#allocation2 + $0x68] sm:$0xff]  ;;  %v1480_v58 = vpop.f32.mrf.mxu1 }
 0x1df   : > { %1198 = vst.msk [vmem:[%s1953_s8 + $0x78] sm:$0xff] %vm298_vm0, %v1166_v23  ;;  %v1164_v26 = vadd.f32 %v1945_v3, %v1125_v24  ;;  %1094 = vst.msk [vmem:[#allocation2 + $0x88] sm:$0xff] %vm298_vm0, %v1062_v12  ;;  %v1067_v28 = vadd.f32 %v1480_v58, %v794_v59 }
 0x1e0   : > { %v1130_v53 = vld [vmem:[#allocation2 + $0x90] sm:$0xff]  ;;  %v998_v6 = vpop.f32.mrf.mxu1 }
 0x1e1   : > { %1196 = vst.msk [vmem:[%s1953_s8 + $0x68] sm:$0xff] %vm298_vm0, %v1164_v26  ;;  %v1169_v41 = vadd.f32 %v1945_v3, %v1130_v53  ;;  %1099 = vst.msk [vmem:[#allocation2 + $0xb0] sm:$0xff] %vm298_vm0, %v1067_v28  ;;  %v1065_v43 = vadd.f32 %v998_v6, %v792_v18 }
 0x1e2   : > { %v1128_v30 = vld [vmem:[#allocation2 + $0x80] sm:$0xff]  ;;  %v1481_v31 = vpop.f32.mrf.mxu1 }
 0x1e3   : > { %1201 = vst.msk [vmem:[%s1953_s8 + $0x90] sm:$0xff] %vm298_vm0, %v1169_v41  ;;  %v1167_v34 = vadd.f32 %v1945_v3, %v1128_v30  ;;  %1097 = vst.msk [vmem:[#allocation2 + $0xa0] sm:$0xff] %vm298_vm0, %v1065_v43  ;;  %v1068_v36 = vadd.f32 %v1481_v31, %v795_v29 }
 0x1e4   : > { %v1131_v37 = vld [vmem:[#allocation2 + $0x98] sm:$0xff]  ;;  %v1001_v38 = vpop.f32.mrf.mxu1 }
 0x1e5   : > { %1199 = vst.msk [vmem:[%s1953_s8 + $0x80] sm:$0xff] %vm298_vm0, %v1167_v34  ;;  %v1170_v42 = vadd.f32 %v1945_v3, %v1131_v37  ;;  %1100 = vst.msk [vmem:[#allocation2 + $0xb8] sm:$0xff] %vm298_vm0, %v1068_v36  ;;  %v1066_v20 = vadd.f32 %v1001_v38, %v793_v33 }
 0x1e6   : > { %v1129_v44 = vld [vmem:[#allocation2 + $0x88] sm:$0xff]  ;;  %v1484_v46 = vpop.f32.mrf.mxu1 }
 0x1e7   : > { %1202 = vst.msk [vmem:[%s1953_s8 + $0x98] sm:$0xff] %vm298_vm0, %v1170_v42  ;;  %v1168_v9 = vadd.f32 %v1945_v3, %v1129_v44  ;;  %1098 = vst.msk [vmem:[#allocation2 + $0xa8] sm:$0xff] %vm298_vm0, %v1066_v20  ;;  %v1071_v48 = vadd.f32 %v1484_v46, %v798_v40 }
 0x1e8   : > { %v1134_v32 = vld [vmem:[#allocation2 + $0xb0] sm:$0xff]  ;;  %v1014_v27 = vpop.f32.mrf.mxu1 }
 0x1e9   : > { %1200 = vst.msk [vmem:[%s1953_s8 + $0x88] sm:$0xff] %vm298_vm0, %v1168_v9  ;;  %v1173_v49 = vadd.f32 %v1945_v3, %v1134_v32  ;;  %1103 = vst.msk [vmem:[#allocation2 + $0xd0] sm:$0xff] %vm298_vm0, %v1071_v48  ;;  %v1069_v50 = vadd.f32 %v1014_v27, %v796_v47 }
 0x1ea   : > { %v1132_v51 = vld [vmem:[#allocation2 + $0xa0] sm:$0xff]  ;;  %v1485_v52 = vpop.f32.mrf.mxu1 }
 0x1eb   : > { %1205 = vst.msk [vmem:[%s1953_s8 + $0xb0] sm:$0xff] %vm298_vm0, %v1173_v49  ;;  %v1171_v55 = vadd.f32 %v1945_v3, %v1132_v51  ;;  %1101 = vst.msk [vmem:[#allocation2 + $0xc0] sm:$0xff] %vm298_vm0, %v1069_v50  ;;  %v1072_v57 = vadd.f32 %v1485_v52, %v799_v56 }
 0x1ec   : > { %v1135_v39 = vld [vmem:[#allocation2 + $0xb8] sm:$0xff]  ;;  %v1017_v19 = vpop.f32.mrf.mxu1 }
 0x1ed   : > { %1203 = vst.msk [vmem:[%s1953_s8 + $0xa0] sm:$0xff] %vm298_vm0, %v1171_v55  ;;  %v1174_v21 = vadd.f32 %v1945_v3, %v1135_v39  ;;  %1104 = vst.msk [vmem:[#allocation2 + $0xd8] sm:$0xff] %vm298_vm0, %v1072_v57  ;;  %v1070_v35 = vadd.f32 %v1017_v19, %v797_v54 }
 0x1ee   : > { %v1133_v61 = vld [vmem:[#allocation2 + $0xa8] sm:$0xff]  ;;  %v1488_v25 = vpop.f32.mrf.mxu1 }
 0x1ef   : > { %1206 = vst.msk [vmem:[%s1953_s8 + $0xb8] sm:$0xff] %vm298_vm0, %v1174_v21  ;;  %v1172_v45 = vadd.f32 %v1945_v3, %v1133_v61  ;;  %1102 = vst.msk [vmem:[#allocation2 + $0xc8] sm:$0xff] %vm298_vm0, %v1070_v35  ;;  %v1075_v62 = vadd.f32 %v1488_v25, %v802_v60 }
 0x1f0   : > { %v1138_v63 = vld [vmem:[#allocation2 + $0xd0] sm:$0xff]  ;;  %v1030_v0 = vpop.f32.mrf.mxu1 }
 0x1f1   : > { %1204 = vst.msk [vmem:[%s1953_s8 + $0xa8] sm:$0xff] %vm298_vm0, %v1172_v45  ;;  %v1177_v4 = vadd.f32 %v1945_v3, %v1138_v63  ;;  %1107 = vst.msk [vmem:[#allocation2 + $0xf0] sm:$0xff] %vm298_vm0, %v1075_v62  ;;  %v1073_v5 = vadd.f32 %v1030_v0, %v800_v11 }
 0x1f2   : > { %v1136_v7 = vld [vmem:[#allocation2 + $0xc0] sm:$0xff]  ;;  %v1489_v8 = vpop.f32.mrf.mxu1 }
 0x1f3   : > { %1209 = vst.msk [vmem:[%s1953_s8 + $0xd0] sm:$0xff] %vm298_vm0, %v1177_v4  ;;  %v1175_v13 = vadd.f32 %v1945_v3, %v1136_v7  ;;  %1105 = vst.msk [vmem:[#allocation2 + $0xe0] sm:$0xff] %vm298_vm0, %v1073_v5  ;;  %v1076_v14 = vadd.f32 %v1489_v8, %v803_v2 }
 0x1f4   : > { %v1139_v16 = vld [vmem:[#allocation2 + $0xd8] sm:$0xff]  ;;  %v1033_v1 = vpop.f32.mrf.mxu1 }
 0x1f5   : > { %1207 = vst.msk [vmem:[%s1953_s8 + $0xc0] sm:$0xff] %vm298_vm0, %v1175_v13  ;;  %v1178_v17 = vadd.f32 %v1945_v3, %v1139_v16  ;;  %1108 = vst.msk [vmem:[#allocation2 + $0xf8] sm:$0xff] %vm298_vm0, %v1076_v14  ;;  %v1074_v15 = vadd.f32 %v1033_v1, %v801_v10 }
 0x1f6   : > { %v1137_v22 = vld [vmem:[#allocation2 + $0xc8] sm:$0xff] }
 0x1f7   : > { %1210 = vst.msk [vmem:[%s1953_s8 + $0xd8] sm:$0xff] %vm298_vm0, %v1178_v17  ;;  %v1176_v59 = vadd.f32 %v1945_v3, %v1137_v22  ;;  %1106 = vst.msk [vmem:[#allocation2 + $0xe8] sm:$0xff] %vm298_vm0, %v1074_v15 }
 0x1f8   : > { %v1142_v23 = vld [vmem:[#allocation2 + $0xf0] sm:$0xff] }
 0x1f9   : > { %1208 = vst.msk [vmem:[%s1953_s8 + $0xc8] sm:$0xff] %vm298_vm0, %v1176_v59  ;;  %v1181_v12 = vadd.f32 %v1945_v3, %v1142_v23 }
 0x1fa   : > { %v1140_v24 = vld [vmem:[#allocation2 + $0xe0] sm:$0xff] }
 0x1fb   : > { %1213 = vst.msk [vmem:[%s1953_s8 + $0xf0] sm:$0xff] %vm298_vm0, %v1181_v12  ;;  %v1179_v58 = vadd.f32 %v1945_v3, %v1140_v24 }
 0x1fc   : > { %v1143_v18 = vld [vmem:[#allocation2 + $0xf8] sm:$0xff] }
 0x1fd   : > { %1211 = vst.msk [vmem:[%s1953_s8 + $0xe0] sm:$0xff] %vm298_vm0, %v1179_v58  ;;  %v1182_v26 = vadd.f32 %v1945_v3, %v1143_v18 }
 0x1fe   : > { %v1141_v28 = vld [vmem:[#allocation2 + $0xe8] sm:$0xff] }
 0x1ff   : > { %1214 = vst.msk [vmem:[%s1953_s8 + $0xf8] sm:$0xff] %vm298_vm0, %v1182_v26  ;;  %v1180_v53 = vadd.f32 %v1945_v3, %v1141_v28 }
 0x201   : > { %1212 = vst.msk [vmem:[%s1953_s8 + $0xe8] sm:$0xff] %vm298_vm0, %v1180_v53 }
 0x202 PF: > { %s15_s20 = sadd.s32 1, %s1627_s20   ;;  %s2094_s18 = smov %s1623_s19 }
 0x203   : > { %p12_p5 = scmp.ge.s32.totalorder %s15_s20, 4   ;;  %s2095_s19 = smov %s2097_s21 }
 0x205   :  { %14 = sbr.rel (!%p12_p5) target bundleno = 2 (0x2), region = 87 }

</bundles_post_ra>
